<compile_context>
chip_gen: v6e
topology: v6e:2x2x1
jax: 0.10.0
libtpu: 0.0.40
codegen_flags: <defaults>
</compile_context>

<pallas_src>
import jax
import jax.numpy as jnp
from jax.experimental import pallas as pl
from jax.experimental.pallas import tpu as pltpu


def _discriminator_kernel(wc_ref, h_pl_ref, h_mi_ref, b_ref, out_ref):
    """One row-tile: two skinny GEMVs + bias, written as two output rows."""
    wc = wc_ref[...]                                   # (n_e, 1), h dtype (resident)
    bias = b_ref[0]                                    # f32 scalar from SMEM
    sc1 = jnp.dot(h_pl_ref[...], wc, preferred_element_type=jnp.float32)  # (tile_n, 1)
    sc2 = jnp.dot(h_mi_ref[...], wc, preferred_element_type=jnp.float32)  # (tile_n, 1)
    # Lane-dense stores: row 0 = sc_1 tile, row 1 = sc_2 tile.  The two narrow
    # (tile_n,1)->(1,tile_n) relayouts stay hidden under the per-step input DMA
    # at the bytes-driven tile sizes chosen below.
    out_ref[0:1, :] = sc1.T + bias
    out_ref[1:2, :] = sc2.T + bias


def _round_up(x, m):
    return -(-x // m) * m


def _vmem_need(tile_n, n_e, itemsize):
    # 2 inputs x 2 pipeline buffers + double-buffered (2, tile_n) f32 output
    # + resident wc (also double-buffered by the pipeline, tiny).
    return (2 * 2 * tile_n * n_e * itemsize
            + 2 * 2 * tile_n * 4
            + 2 * n_e * itemsize)


def _choose_tiling(N, n_e, itemsize):
    """Bytes-driven row tile, coupled to a generation-aware VMEM budget."""
    try:
        vmem_cap = int(pltpu.get_tpu_info().vmem_capacity_bytes)
    except Exception:  # fallback (e.g. interpret mode): assume smallest (v7x) VMEM
        vmem_cap = 64 << 20
    budget = int(0.6 * vmem_cap)          # leave headroom for compiler scratch

    # ~4 MiB per input block: DMA time per step is well above the ~0.35 us
    # per-grid-step overhead even at v7x's 3.2 TB/s, and 2 inputs x 2 buffers
    # (16 MiB) fits comfortably inside even the 0.6 * 64 MiB v7x budget.
    target_block_bytes = 4 << 20
    tile_n = (target_block_bytes // max(1, n_e * itemsize)) // 128 * 128
    tile_n = max(tile_n, 512)

    if tile_n >= N:
        # Whole problem in one block: a full-extent block is always legal.
        tile_n = N
    else:
        # Shrink (keeping a multiple of 128 rows) until the double-buffered
        # working set fits the budget.
        while tile_n > 128 and _vmem_need(tile_n, n_e, itemsize) > budget:
            tile_n = max(128, (tile_n // 2) // 128 * 128)
        # TODO(synk): for extreme n_e where even a 128-row tile exceeds the
        # VMEM budget, add an "arbitrary" n_e grid axis with an f32 accumulator.

    grid_n = pl.cdiv(N, tile_n)
    # Balanced megacore split on v7x: prefer an even number of row blocks.
    if grid_n > 1 and grid_n % 2 == 1:
        tile_even = _round_up(pl.cdiv(N, grid_n + 1), 128)
        if 128 <= tile_even < N and pl.cdiv(N, tile_even) % 2 == 0:
            tile_n = tile_even
            grid_n = pl.cdiv(N, tile_n)

    vmem_limit = max(budget, 16 << 20)
    return tile_n, grid_n, vmem_limit


def discriminator_forward(c, h_pl, h_mi, weight, bias, s_bias1=None, s_bias2=None):
    """JAX/Pallas equivalent of Discriminator.forward.

    c:      (n_g,)        graph embedding
    h_pl:   (N, n_e)      positive embeddings (any float dtype, kept native)
    h_mi:   (N, n_e)      negative embeddings
    weight: (1, n_e, n_g) Bilinear weight
    bias:   (1,)          Bilinear bias
    returns logits: (2N,) float32
    """
    N, n_e = h_pl.shape
    n_g = c.shape[0]

    # Hoist wc = W @ c out of the tile loop (plain XLA GEMV, tiny). Cast to the
    # h dtype so the MXU consumes matched operands and streams no extra bytes.
    # (Intentional precision tradeoff: wc is rounded to bf16 when h is bf16.)
    wc = weight.reshape(n_e, n_g).astype(jnp.float32) @ c.astype(jnp.float32)
    wc = wc.reshape(n_e, 1).astype(h_pl.dtype)
    b1 = bias.reshape(1).astype(jnp.float32)

    itemsize = jnp.dtype(h_pl.dtype).itemsize
    tile_n, grid_n, vmem_limit = _choose_tiling(N, n_e, itemsize)

    h_spec = pl.BlockSpec((tile_n, n_e), lambda i: (i, 0))

    flops = 2 * (2 * N * n_e)
    bytes_accessed = 2 * N * n_e * itemsize + n_e * itemsize + 2 * N * 4 + 4

    out = pl.pallas_call(
        _discriminator_kernel,
        out_shape=jax.ShapeDtypeStruct((2, N), jnp.float32),
        grid_spec=pltpu.PrefetchScalarGridSpec(
            num_scalar_prefetch=0,
            grid=(grid_n,),
            in_specs=[
                pl.BlockSpec((n_e, 1), lambda i: (0, 0)),            # wc (resident)
                h_spec,                                               # h_pl tile
                h_spec,                                               # h_mi tile
                pl.BlockSpec(memory_space=pltpu.MemorySpace.SMEM),    # bias scalar
            ],
            out_specs=pl.BlockSpec((2, tile_n), lambda i: (0, i)),
        ),
        compiler_params=pltpu.CompilerParams(
            dimension_semantics=("parallel",),   # shard row loop over v7x's 2 TCs
            vmem_limit_bytes=vmem_limit,
        ),
        cost_estimate=pl.CostEstimate(
            flops=flops, transcendentals=0, bytes_accessed=bytes_accessed),
    )(wc, h_pl, h_mi, b1)

    if s_bias1 is None and s_bias2 is None:
        # Row-major (2, N) flattens to exactly [sc_1, sc_2] — free reshape.
        return out.reshape(2 * N)
    sc_1 = out[0]
    sc_2 = out[1]
    if s_bias1 is not None:
        sc_1 = sc_1 + s_bias1
    if s_bias2 is not None:
        sc_2 = sc_2 + s_bias2
    return jnp.concatenate([sc_1, sc_2], axis=0)


def init_bilinear_params(key, n_e, n_g):
    """Deterministic xavier_uniform init for nn.Bilinear(n_e, n_g, 1)."""
    fan_in = n_e * n_g
    fan_out = 1 * n_g
    bound = (6.0 / (fan_in + fan_out)) ** 0.5
    weight = jax.random.uniform(
        key, (1, n_e, n_g), minval=-bound, maxval=bound, dtype=jnp.float32
    )
    bias = jnp.zeros((1,), dtype=jnp.float32)
    return weight, bias


def _reference_forward(c, h_pl, h_mi, weight, bias):
    # Pure-JAX reference mirroring the kernel's wc quantization to the h dtype.
    W = weight[0].astype(jnp.float32)                  # (n_e, n_g)
    wc = (W @ c.astype(jnp.float32)).astype(h_pl.dtype).astype(jnp.float32)
    sc_1 = h_pl.astype(jnp.float32) @ wc + bias[0]
    sc_2 = h_mi.astype(jnp.float32) @ wc + bias[0]
    return jnp.concatenate([sc_1, sc_2], axis=0)


if __name__ == "__main__":
    key = jax.random.PRNGKey(0)

    # --- Small f32 case (matches the module's toy scale; single-tile path) ---
    n_e, n_g, N = 32, 16, 8
    k_w, k_c, k_pl, k_mi, key = jax.random.split(key, 5)
    weight, bias = init_bilinear_params(k_w, n_e, n_g)
    c = jax.random.normal(k_c, (n_g,), dtype=jnp.float32)
    h_pl = jax.random.normal(k_pl, (N, n_e), dtype=jnp.float32)
    h_mi = jax.random.normal(k_mi, (N, n_e), dtype=jnp.float32)

    logits = jax.block_until_ready(
        discriminator_forward(c, h_pl, h_mi, weight, bias))
    ref = _reference_forward(c, h_pl, h_mi, weight, bias)
    assert logits.shape == (2 * N,)
    assert jnp.allclose(logits, ref, atol=1e-4, rtol=1e-4)

    # --- Larger bf16 case exercising the bytes-driven tiling, the even-grid
    #     adjustment (grid 3 -> 4), and a ragged trailing block masked by
    #     Pallas (N2 not a multiple of the tile). ---
    n_e2, n_g2, N2 = 1024, 64, 5000
    k_w2, k_c2, k_pl2, k_mi2 = jax.random.split(key, 4)
    weight2, bias2 = init_bilinear_params(k_w2, n_e2, n_g2)
    c2 = jax.random.normal(k_c2, (n_g2,), dtype=jnp.float32)
    h_pl2 = jax.random.normal(k_pl2, (N2, n_e2), dtype=jnp.float32).astype(jnp.bfloat16)
    h_mi2 = jax.random.normal(k_mi2, (N2, n_e2), dtype=jnp.float32).astype(jnp.bfloat16)

    logits2 = jax.block_until_ready(
        discriminator_forward(c2, h_pl2, h_mi2, weight2, bias2))
    ref2 = _reference_forward(c2, h_pl2, h_mi2, weight2, bias2)
    assert logits2.shape == (2 * N2,)
    assert jnp.allclose(logits2, ref2, atol=5e-3, rtol=5e-3)

    print("KERNEL_OK")
</pallas_src>

<mosaic_0001>
module attributes {stable_mosaic.version = 11 : i64} {
  func.func @_discriminator_kernel(%arg0: i32, %arg1: memref<32x1xf32, #tpu.memory_space<vmem>>, %arg2: memref<8x32xf32, #tpu.memory_space<vmem>>, %arg3: memref<8x32xf32, #tpu.memory_space<vmem>>, %arg4: memref<1xf32, #tpu.memory_space<smem>>, %arg5: memref<2x8xf32, #tpu.memory_space<vmem>>) attributes {dimension_semantics = [#tpu.dimension_semantics<parallel>], iteration_bounds = array<i64: 1>, scalar_prefetch = 0 : i64, scratch_operands = 0 : i64, tpu.core_type = #tpu.core_type<tc>, window_params = [{pipeline_mode = #tpu.pipeline_mode<synchronous>, transform_indices = @transform_0, window_bounds = array<i64: 32, 1>}, {transform_indices = @transform_1, window_bounds = array<i64: 8, 32>}, {transform_indices = @transform_2, window_bounds = array<i64: 8, 32>}, {transform_indices = @transform_3, window_bounds = array<i64: 1>}, {transform_indices = @transform_4, window_bounds = array<i64: 2, 8>}]} {
    %c0 = arith.constant 0 : index
    %c0_0 = arith.constant 0 : index
    %0 = vector.load %arg1[%c0, %c0_0] : memref<32x1xf32, #tpu.memory_space<vmem>>, vector<32x1xf32>
    %c0_1 = arith.constant 0 : index
    %1 = memref.load %arg4[%c0_1] : memref<1xf32, #tpu.memory_space<smem>>
    %c0_2 = arith.constant 0 : index
    %c0_3 = arith.constant 0 : index
    %2 = vector.load %arg2[%c0_2, %c0_3] : memref<8x32xf32, #tpu.memory_space<vmem>>, vector<8x32xf32>
    %cst = arith.constant dense<0.000000e+00> : vector<8x1xf32>
    %3 = tpu.matmul %2, %0, %cst {dimension_numbers = #tpu.dot_dimension_numbers<[1], [0], [0], [1], [0, 0, 1, 1], [], []>} : vector<8x32xf32>, vector<32x1xf32>, vector<8x1xf32> -> vector<8x1xf32>
    %c0_4 = arith.constant 0 : index
    %c0_5 = arith.constant 0 : index
    %4 = vector.load %arg3[%c0_4, %c0_5] : memref<8x32xf32, #tpu.memory_space<vmem>>, vector<8x32xf32>
    %cst_6 = arith.constant dense<0.000000e+00> : vector<8x1xf32>
    %5 = tpu.matmul %4, %0, %cst_6 {dimension_numbers = #tpu.dot_dimension_numbers<[1], [0], [0], [1], [0, 0, 1, 1], [], []>} : vector<8x32xf32>, vector<32x1xf32>, vector<8x1xf32> -> vector<8x1xf32>
    %6 = tpu.transpose %3, [1, 0] : vector<8x1xf32> -> vector<1x8xf32>
    %7 = vector.broadcast %1 : f32 to vector<1x8xf32>
    %8 = arith.addf %6, %7 : vector<1x8xf32>
    %c0_7 = arith.constant 0 : index
    %c0_8 = arith.constant 0 : index
    %9 = vector.load %arg5[%c0_7, %c0_8] : memref<2x8xf32, #tpu.memory_space<vmem>>, vector<1x8xf32>
    tpu.vector_store %arg5[%c0_7, %c0_8], %8 {strides = array<i32>} : memref<2x8xf32, #tpu.memory_space<vmem>>, vector<1x8xf32>,
    %10 = tpu.transpose %5, [1, 0] : vector<8x1xf32> -> vector<1x8xf32>
    %11 = vector.broadcast %1 : f32 to vector<1x8xf32>
    %12 = arith.addf %10, %11 : vector<1x8xf32>
    %c1 = arith.constant 1 : index
    %c0_9 = arith.constant 0 : index
    %13 = vector.load %arg5[%c1, %c0_9] : memref<2x8xf32, #tpu.memory_space<vmem>>, vector<1x8xf32>
    tpu.vector_store %arg5[%c1, %c0_9], %12 {strides = array<i32>} : memref<2x8xf32, #tpu.memory_space<vmem>>, vector<1x8xf32>,
    return
  }
  func.func @transform_0(%arg0: i32) -> (i32, i32) {
    %c0_i32 = arith.constant 0 : i32
    %c0_i32_0 = arith.constant 0 : i32
    %c0_i32_1 = arith.constant 0 : i32
    return %c0_i32, %c0_i32_0 : i32, i32
  }
  func.func @transform_1(%arg0: i32) -> (i32, i32) {
    %c0_i32 = arith.constant 0 : i32
    %c0_i32_0 = arith.constant 0 : i32
    return %arg0, %c0_i32 : i32, i32
  }
  func.func @transform_2(%arg0: i32) -> (i32, i32) {
    %c0_i32 = arith.constant 0 : i32
    %c0_i32_0 = arith.constant 0 : i32
    return %arg0, %c0_i32 : i32, i32
  }
  func.func @transform_3(%arg0: i32) -> i32 {
    %c0_i32 = arith.constant 0 : i32
    %c0_i32_0 = arith.constant 0 : i32
    return %c0_i32 : i32
  }
  func.func @transform_4(%arg0: i32) -> (i32, i32) {
    %c0_i32 = arith.constant 0 : i32
    %c0_i32_0 = arith.constant 0 : i32
    return %c0_i32, %arg0 : i32, i32
  }
}

</mosaic_0001>

<bundles_post_ra>
// kernel: tpu_custom_call.1
= control target key start
LH: loop header
LB: loop body
LE: loop exit
PB: predicated region body
PF: predicated region fallthrough
CT: control target
= control target key end

     0   :  { %v316_v1 = vmov 0.0   ;;  %s368_s0 = inlined_call_operand.vmem [shape: f32[32,1], index: 0, kind: input, shape index: {}]   ;;  %s369_s1 = inlined_call_operand.vmem [shape: f32[8,32], index: 1, kind: input, shape index: {}]   ;;  %s370_s2 = inlined_call_operand.vmem [shape: f32[8,32], index: 2, kind: input, shape index: {}]   ;;  %s371_s3 = inlined_call_operand.<no memory space> [shape: f32[1], index: 3, kind: input, shape index: {}]   ;;  %s372_s4 = inlined_call_operand.hbm [shape: f32[2,8], index: 4, kind: output, shape index: {}]  }
   0x1   :  { %v22_v0 = vld [vmem:[%s368_s0 + $0x18] sm:$0xff]  ;;  %269 = vmatprep.subr.mxu0 %v316_v1  ;;  %280 = vmatprep.subr.mxu1 %v316_v1  ;;  %v21_v2 = vld [vmem:[%s368_s0 + $0x10] sm:$0xff] }
   0x2   :  { %270 = vmatpush3.msra.mxu0 %v22_v0  ;;  %281 = vmatpush3.msra.mxu1 %v22_v0 }
   0x3   :  { %10 = vsyncpa [#allocation4], 0  ;;  %271 = vmatprep.subr.mxu0 %v316_v1  ;;  %282 = vmatprep.subr.mxu1 %v316_v1  ;;  %v20_v3 = vld [vmem:[%s368_s0 + $0x8] sm:$0xff]  ;;  %v19_v4 = vld [vmem:[%s368_s0] sm:$0xff]  ;;  %vm317_vm0 = vmmov 0   ;;  %vm25_vm1 = vcmask 261120   ;;  %v205_v11 = vstv %s371_s3 }
   0x4   :  { %272 = vmatpush3.msra.mxu0 %v21_v2  ;;  %283 = vmatpush3.msra.mxu1 %v21_v2  ;;  %v24_v5 = vld [vmem:[%s369_s1] sm:$0xff]  ;;  %vm207_vm2 = vcmask 57344   ;;  %s318_s27 = smov [#allocation3]  }
   0x5   :  { %273 = vmatprep.subr.mxu0 %v316_v1  ;;  %284 = vmatprep.subr.mxu1 %v316_v1  ;;  %v99_v6 = vld [vmem:[%s370_s2] sm:$0xff]  ;;  %s249_s28 = sshll.u32 %s318_s27, 4  ;;  %s250_s28 = int_to_ptr.vmem [resolvable:$true] %s249_s28 }
   0x6   :  { %274 = vmatpush3.msra.mxu0 %v20_v3  ;;  %277 = vmatprep.mubr.msk.f32.mxu0 %vm317_vm0, %v316_v1  ;;  %s294_s2 = scalar_lea.vmem %s250_s28, 32  ;;  %p299_p1 = scmp.lt.s32.totalorder %s250_s28, %s250_s28 }
   0x7   :  { %275 = vmatprep.subr.mxu0 %v316_v1  ;;  %285 = vmatpush3.msra.mxu1 %v20_v3  ;;  %p295_p0 = scmp.ne.s32.totalorder %s250_s28, %s294_s2  ;;  %p300_p2 = scmp.lt.s32.totalorder %s294_s2, %s294_s2 }
   0x8   :  { %276 = vmatpush3.msra.mxu0 %v19_v4  ;;  %286 = vmatprep.subr.mxu1 %v316_v1 }
   0x9   :  { %278 = vmatmul.mubr.msk.f32.vlgmr.msra.gmra.mxu0 %vm25_vm1, %v24_v5  ;;  %287 = vmatpush3.msra.mxu1 %v19_v4  ;;  %p301_p3 = por %p300_p2, %p299_p1 }
   0xa   :  { %288 = vmatprep.mubr.msk.f32.mxu1 %vm317_vm0, %v316_v1 }
   0xb   :  { %289 = vmatmul.mubr.msk.f32.vlgmr.msra.gmra.mxu1 %vm25_vm1, %v99_v6  ;;  %p302_p4 = pnand %p301_p3, %p295_p0 }
  0xc9   :  { %v95_v7 = vpop.f32.mrf.mxu0 }
  0xca   :  { %173 = vxpose.xlu0.b32.start.end [1/1] (short) (narrow) %v95_v7, 8 }
  0xcb   :  { %v279_v8 = vpop.f32.mrf.mxu0  ;;  %v169_v9 = vpop.f32.mrf.mxu1 }
  0xcd   :  { %v290_v10 = vpop.f32.mrf.mxu1 }
  0xce   :  { %209 = vxpose.xlu0.b32.start.end [1/1] (short) (narrow) %v169_v9, 8 }
 0x146   :  { %v189_v12 = vpop.trf.xlu0 }
 0x147   :  { %v206_v13 = vadd.f32 %v205_v11, %v189_v12 }
 0x149   :  { %208 = vst.msk [vmem:[#allocation3] sm:$0x1] %vm207_vm2, %v206_v13 }
 0x14a   :  { %v225_v14 = vpop.trf.xlu0 }
 0x14b   :  { %v241_v15 = vadd.f32 %v225_v14, %v205_v11 }
 0x14d   :  { %242 = vst.msk [vmem:[#allocation3 + $0x1] sm:$0x1] %vm207_vm2, %v241_v15 }
 0x14e   :  { %305 = shalt.err (!%p302_p4)
}
 0x14f   :  { %252 = dma.vmem_to_hbm [thread:$0]  %s250_s28, 32, %s372_s4, [#allocation4]  }
 0x150   :  { %314 = dma.done.wait [#allocation4], 32  }
 0x151   :  { %315 = vsyncadd [#allocation4], 4294967264 }
 0x152   :  { %256 = vsyncpa [#allocation4], 1 }

</bundles_post_ra>
